<compile_context>
chip_gen: v5e
topology: v5e:2x2
jax: 0.10.0
libtpu: 0.0.40
codegen_flags: <defaults>
</compile_context>

<pallas_src>
import functools

import jax
import jax.numpy as jnp
from jax import lax
from jax.experimental import pallas as pl
from jax.experimental.pallas import tpu as pltpu


def _patch_embed_kernel(p_ref, w_ref, b_ref, g_ref, beta_ref, o_ref, *, eps, cemb):
    # p_ref:    (TM, K)     im2col patches for TM output tokens (bf16)
    # w_ref:    (K, Cpad)   conv weight as GEMM matrix, zero-padded cols (bf16, resident)
    # b_ref:    (1, Cpad)   conv bias, zero-padded (f32)
    # g_ref:    (1, Cpad)   LayerNorm gamma, zero-padded (f32)
    # beta_ref: (1, Cpad)   LayerNorm beta, zero-padded (f32)
    # o_ref:    (TM, Cpad)  normalized token embeddings (padded cols are 0)
    x = jnp.dot(p_ref[...], w_ref[...], preferred_element_type=jnp.float32)
    x = x + b_ref[...].astype(jnp.float32)

    # LayerNorm over the *true* embedding dim (cemb), matching torch.nn.LayerNorm
    # (biased variance, eps inside sqrt).  Padded columns of x are exactly 0
    # (zero-padded weight & bias), so plain sums divided by cemb give the correct
    # mean; the variance uses a lane mask so padded columns contribute nothing.
    inv_c = jnp.float32(1.0 / cemb)
    mean = jnp.sum(x, axis=-1, keepdims=True) * inv_c
    xc = x - mean
    valid = lax.broadcasted_iota(jnp.int32, x.shape, 1) < cemb
    xc_m = jnp.where(valid, xc, 0.0)
    var = jnp.sum(xc_m * xc_m, axis=-1, keepdims=True) * inv_c
    inv = lax.rsqrt(var + eps)
    # gamma/beta padded with zeros -> padded output columns are 0.
    y = xc * inv * g_ref[...].astype(jnp.float32) + beta_ref[...].astype(jnp.float32)
    o_ref[...] = y.astype(o_ref.dtype)


def overlap_patch_embed_forward(x, conv_w, conv_b, ln_g, ln_b, *,
                                patch_size=7, stride=4, eps=1e-5, tm=512):
    """Forward pass of OverlapPatchEmbed.

    Args:
      x:      (B, Cin, H, W) image, NCHW (PyTorch layout)
      conv_w: (Cemb, Cin, patch_size, patch_size) Conv2d weight
      conv_b: (Cemb,) Conv2d bias
      ln_g:   (Cemb,) LayerNorm weight
      ln_b:   (Cemb,) LayerNorm bias
    Returns:
      (tokens (B, newH*newW, Cemb), newH, newW)
    """
    B, Cin, H, W = x.shape
    Cemb = conv_w.shape[0]
    assert conv_w.shape == (Cemb, Cin, patch_size, patch_size), conv_w.shape

    # Matches the module spec exactly.
    pad = 0 if patch_size % 2 == 0 else patch_size // 2
    newH = (H + 2 * pad - patch_size) // stride + 1
    newW = (W + 2 * pad - patch_size) // stride + 1
    K = Cin * patch_size * patch_size

    # ---- im2col in NHWC (data movement only; all conv FLOPs go to the MXU).
    # Taps concatenate along the trailing channel axis -> flatten order is
    # (kh, kw, cin); no (M, K)-sized transpose copy is materialized.
    x_nhwc = jnp.transpose(x, (0, 2, 3, 1))                      # (B, H, W, Cin)
    xp = jnp.pad(x_nhwc, ((0, 0), (pad, pad), (pad, pad), (0, 0)))
    taps = []
    for kh in range(patch_size):
        for kw in range(patch_size):
            taps.append(
                lax.slice(
                    xp,
                    (0, kh, kw, 0),
                    (B,
                     kh + stride * (newH - 1) + 1,
                     kw + stride * (newW - 1) + 1,
                     Cin),
                    (1, stride, stride, 1),
                ))
    patches = jnp.concatenate(taps, axis=-1).reshape(B * newH * newW, K)

    # GEMM weight in matching (KH, KW, Cin) flatten order: (Cemb,Cin,KH,KW)->(K,Cemb)
    w_mat = jnp.transpose(conv_w, (2, 3, 1, 0)).reshape(K, Cemb)

    # Pad the feature dim up to a lane-dense multiple of 128 (zero columns).
    Cpad = pl.cdiv(Cemb, 128) * 128
    cpad_extra = Cpad - Cemb
    w_mat = jnp.pad(w_mat, ((0, 0), (0, cpad_extra)))
    b2 = jnp.pad(conv_b, (0, cpad_extra)).reshape(1, Cpad).astype(jnp.float32)
    g2 = jnp.pad(ln_g, (0, cpad_extra)).reshape(1, Cpad).astype(jnp.float32)
    beta2 = jnp.pad(ln_b, (0, cpad_extra)).reshape(1, Cpad).astype(jnp.float32)

    # bf16 GEMM operands (accumulation stays f32 inside the kernel).
    patches = patches.astype(jnp.bfloat16)
    w_mat = w_mat.astype(jnp.bfloat16)

    # ---- token-tile selection.
    M = B * newH * newW
    # Guarantee >=2 grid steps when possible so dual-TC chips (v7x) stay busy.
    tm_cap = max(8, pl.cdiv(pl.cdiv(M, 2), 8) * 8)
    tm = max(8, min(tm, tm_cap))
    Mp = pl.cdiv(M, tm) * tm
    if Mp != M:
        # Padded rows are all-zero; LayerNorm of a zero row is finite thanks to eps,
        # and the rows are sliced off below.
        patches = jnp.pad(patches, ((0, Mp - M), (0, 0)))

    cost = pl.CostEstimate(
        flops=2 * Mp * K * Cpad,
        transcendentals=Mp,  # one rsqrt per token
        bytes_accessed=(Mp * K * 2            # bf16 patches read
                        + K * Cpad * 2        # bf16 weight read
                        + 3 * Cpad * 4        # bias / gamma / beta
                        + Mp * Cpad * x.dtype.itemsize),  # output write
    )

    out = pl.pallas_call(
        functools.partial(_patch_embed_kernel, eps=eps, cemb=Cemb),
        out_shape=jax.ShapeDtypeStruct((Mp, Cpad), x.dtype),
        grid_spec=pltpu.PrefetchScalarGridSpec(
            num_scalar_prefetch=0,
            grid=(Mp // tm,),
            in_specs=[
                pl.BlockSpec((tm, K), lambda i: (i, 0)),      # patch tile
                pl.BlockSpec((K, Cpad), lambda i: (0, 0)),    # resident weight
                pl.BlockSpec((1, Cpad), lambda i: (0, 0)),    # conv bias
                pl.BlockSpec((1, Cpad), lambda i: (0, 0)),    # LN gamma
                pl.BlockSpec((1, Cpad), lambda i: (0, 0)),    # LN beta
            ],
            out_specs=pl.BlockSpec((tm, Cpad), lambda i: (i, 0)),
        ),
        compiler_params=pltpu.CompilerParams(
            dimension_semantics=("parallel",),
            vmem_limit_bytes=32 * 1024 * 1024,
        ),
        cost_estimate=cost,
    )(patches, w_mat, b2, g2, beta2)

    out = out[:M, :Cemb].reshape(B, newH * newW, Cemb)
    return out, newH, newW


if __name__ == "__main__":
    # Small deterministic example consistent with the module defaults
    # (in_chans=3, embed_dim=96, patch_size=7, stride=4) at reduced spatial size.
    B, Cin, H, W = 2, 3, 32, 32
    patch_size, stride, Cemb = 7, 4, 96

    key = jax.random.PRNGKey(0)
    kx, kw, kb = jax.random.split(key, 3)
    x = jax.random.normal(kx, (B, Cin, H, W), dtype=jnp.float32)
    conv_w = jax.random.normal(kw, (Cemb, Cin, patch_size, patch_size),
                               dtype=jnp.float32) * 0.05
    conv_b = jax.random.normal(kb, (Cemb,), dtype=jnp.float32) * 0.05
    ln_g = jnp.ones((Cemb,), jnp.float32)   # nn.LayerNorm init
    ln_b = jnp.zeros((Cemb,), jnp.float32)

    out, newH, newW = overlap_patch_embed_forward(
        x, conv_w, conv_b, ln_g, ln_b, patch_size=patch_size, stride=stride)
    jax.block_until_ready(out)

    pad = 0 if patch_size % 2 == 0 else patch_size // 2
    assert newH == (H + 2 * pad - patch_size) // stride + 1
    assert newW == (W + 2 * pad - patch_size) // stride + 1
    assert out.shape == (B, newH * newW, Cemb)

    # Pure-JAX f32 reference: conv -> flatten/transpose -> LayerNorm.
    ref = lax.conv_general_dilated(
        x, conv_w, window_strides=(stride, stride),
        padding=[(pad, pad)] * 2,
        dimension_numbers=("NCHW", "OIHW", "NCHW"))
    ref = ref + conv_b[None, :, None, None]
    ref = ref.reshape(B, Cemb, newH * newW).transpose(0, 2, 1)
    mu = ref.mean(-1, keepdims=True)
    var = ((ref - mu) ** 2).mean(-1, keepdims=True)
    ref = (ref - mu) * lax.rsqrt(var + 1e-5) * ln_g + ln_b

    # bf16 GEMM operands -> slightly looser tolerance vs the f32 reference.
    err = float(jnp.max(jnp.abs(out - ref)))
    assert err < 5e-2, f"max abs err {err}"
    print("KERNEL_OK")
</pallas_src>

<mosaic_0001>
module attributes {stable_mosaic.version = 11 : i64} {
  func.func @_patch_embed_kernel(%arg0: i32, %arg1: memref<64x147xbf16, #tpu.memory_space<vmem>>, %arg2: memref<147x128xbf16, #tpu.memory_space<vmem>>, %arg3: memref<1x128xf32, #tpu.memory_space<vmem>>, %arg4: memref<1x128xf32, #tpu.memory_space<vmem>>, %arg5: memref<1x128xf32, #tpu.memory_space<vmem>>, %arg6: memref<64x128xf32, #tpu.memory_space<vmem>>) attributes {dimension_semantics = [#tpu.dimension_semantics<parallel>], iteration_bounds = array<i64: 2>, scalar_prefetch = 0 : i64, scratch_operands = 0 : i64, tpu.core_type = #tpu.core_type<tc>, window_params = [{transform_indices = @transform_0, window_bounds = array<i64: 64, 147>}, {pipeline_mode = #tpu.pipeline_mode<synchronous>, transform_indices = @transform_1, window_bounds = array<i64: 147, 128>}, {pipeline_mode = #tpu.pipeline_mode<synchronous>, transform_indices = @transform_2, window_bounds = array<i64: 1, 128>}, {pipeline_mode = #tpu.pipeline_mode<synchronous>, transform_indices = @transform_3, window_bounds = array<i64: 1, 128>}, {pipeline_mode = #tpu.pipeline_mode<synchronous>, transform_indices = @transform_4, window_bounds = array<i64: 1, 128>}, {transform_indices = @transform_5, window_bounds = array<i64: 64, 128>}]} {
    %c0 = arith.constant 0 : index
    %c0_0 = arith.constant 0 : index
    %0 = vector.load %arg1[%c0, %c0_0] : memref<64x147xbf16, #tpu.memory_space<vmem>>, vector<64x147xbf16>
    %c0_1 = arith.constant 0 : index
    %c0_2 = arith.constant 0 : index
    %1 = vector.load %arg2[%c0_1, %c0_2] : memref<147x128xbf16, #tpu.memory_space<vmem>>, vector<147x128xbf16>
    %cst = arith.constant dense<0.000000e+00> : vector<64x128xf32>
    %2 = tpu.matmul %0, %1, %cst {dimension_numbers = #tpu.dot_dimension_numbers<[1], [0], [0], [1], [0, 0, 1, 1], [], []>} : vector<64x147xbf16>, vector<147x128xbf16>, vector<64x128xf32> -> vector<64x128xf32>
    %c0_3 = arith.constant 0 : index
    %c0_4 = arith.constant 0 : index
    %3 = vector.load %arg3[%c0_3, %c0_4] : memref<1x128xf32, #tpu.memory_space<vmem>>, vector<1x128xf32>
    %4 = vector.broadcast %3 : vector<1x128xf32> to vector<64x128xf32>
    %5 = arith.addf %2, %4 : vector<64x128xf32>
    %cst_5 = arith.constant dense<0.000000e+00> : vector<64xf32>
    %6 = vector.multi_reduction <add>, %5, %cst_5 [1] : vector<64x128xf32> to vector<64xf32>
    %7 = vector.shape_cast %6 : vector<64xf32> to vector<64x1xf32>
    %cst_6 = arith.constant 0.010416667 : f32
    %8 = vector.broadcast %cst_6 : f32 to vector<64x1xf32>
    %9 = arith.mulf %7, %8 : vector<64x1xf32>
    %10 = vector.broadcast %9 : vector<64x1xf32> to vector<64x128xf32>
    %11 = arith.subf %5, %10 : vector<64x128xf32>
    %12 = tpu.iota {dimensions = array<i32: 1>} : vector<64x128xi32>
    %c96_i32 = arith.constant 96 : i32
    %13 = vector.broadcast %c96_i32 : i32 to vector<64x128xi32>
    %14 = arith.cmpi slt, %12, %13 : vector<64x128xi32>
    %cst_7 = arith.constant 0.000000e+00 : f32
    %15 = vector.broadcast %cst_7 : f32 to vector<64x128xf32>
    %16 = arith.select %14, %11, %15 : vector<64x128xi1>, vector<64x128xf32>
    %17 = arith.mulf %16, %16 : vector<64x128xf32>
    %cst_8 = arith.constant dense<0.000000e+00> : vector<64xf32>
    %18 = vector.multi_reduction <add>, %17, %cst_8 [1] : vector<64x128xf32> to vector<64xf32>
    %19 = vector.shape_cast %18 : vector<64xf32> to vector<64x1xf32>
    %cst_9 = arith.constant 0.010416667 : f32
    %20 = vector.broadcast %cst_9 : f32 to vector<64x1xf32>
    %21 = arith.mulf %19, %20 : vector<64x1xf32>
    %cst_10 = arith.constant 9.99999974E-6 : f32
    %22 = vector.broadcast %cst_10 : f32 to vector<64x1xf32>
    %23 = arith.addf %21, %22 : vector<64x1xf32>
    %24 = math.rsqrt %23 : vector<64x1xf32>
    %25 = vector.broadcast %24 : vector<64x1xf32> to vector<64x128xf32>
    %26 = arith.mulf %11, %25 : vector<64x128xf32>
    %c0_11 = arith.constant 0 : index
    %c0_12 = arith.constant 0 : index
    %27 = vector.load %arg4[%c0_11, %c0_12] : memref<1x128xf32, #tpu.memory_space<vmem>>, vector<1x128xf32>
    %28 = vector.broadcast %27 : vector<1x128xf32> to vector<64x128xf32>
    %29 = arith.mulf %26, %28 : vector<64x128xf32>
    %c0_13 = arith.constant 0 : index
    %c0_14 = arith.constant 0 : index
    %30 = vector.load %arg5[%c0_13, %c0_14] : memref<1x128xf32, #tpu.memory_space<vmem>>, vector<1x128xf32>
    %31 = vector.broadcast %30 : vector<1x128xf32> to vector<64x128xf32>
    %32 = arith.addf %29, %31 : vector<64x128xf32>
    %c0_15 = arith.constant 0 : index
    %c0_16 = arith.constant 0 : index
    %33 = vector.load %arg6[%c0_15, %c0_16] : memref<64x128xf32, #tpu.memory_space<vmem>>, vector<64x128xf32>
    tpu.vector_store %arg6[%c0_15, %c0_16], %32 {strides = array<i32>} : memref<64x128xf32, #tpu.memory_space<vmem>>, vector<64x128xf32>,
    return
  }
  func.func @transform_0(%arg0: i32) -> (i32, i32) {
    %c0_i32 = arith.constant 0 : i32
    %c0_i32_0 = arith.constant 0 : i32
    return %arg0, %c0_i32 : i32, i32
  }
  func.func @transform_1(%arg0: i32) -> (i32, i32) {
    %c0_i32 = arith.constant 0 : i32
    %c0_i32_0 = arith.constant 0 : i32
    %c0_i32_1 = arith.constant 0 : i32
    return %c0_i32, %c0_i32_0 : i32, i32
  }
  func.func @transform_2(%arg0: i32) -> (i32, i32) {
    %c0_i32 = arith.constant 0 : i32
    %c0_i32_0 = arith.constant 0 : i32
    %c0_i32_1 = arith.constant 0 : i32
    return %c0_i32, %c0_i32_0 : i32, i32
  }
  func.func @transform_3(%arg0: i32) -> (i32, i32) {
    %c0_i32 = arith.constant 0 : i32
    %c0_i32_0 = arith.constant 0 : i32
    %c0_i32_1 = arith.constant 0 : i32
    return %c0_i32, %c0_i32_0 : i32, i32
  }
  func.func @transform_4(%arg0: i32) -> (i32, i32) {
    %c0_i32 = arith.constant 0 : i32
    %c0_i32_0 = arith.constant 0 : i32
    %c0_i32_1 = arith.constant 0 : i32
    return %c0_i32, %c0_i32_0 : i32, i32
  }
  func.func @transform_5(%arg0: i32) -> (i32, i32) {
    %c0_i32 = arith.constant 0 : i32
    %c0_i32_0 = arith.constant 0 : i32
    return %arg0, %c0_i32 : i32, i32
  }
}

</mosaic_0001>

<bundles_post_ra>
// kernel: tpu_custom_call.1
= control target key start
LH: loop header
LB: loop body
LE: loop exit
PB: predicated region body
PF: predicated region fallthrough
CT: control target
= control target key end

     0   :  { %10 = vsyncpa [#allocation3], 0  ;;  %s1220_s0 = inlined_call_operand.vmem [shape: bf16[128,147], index: 0, kind: input, shape index: {}]   ;;  %s1221_s1 = inlined_call_operand.vmem [shape: bf16[147,128], index: 1, kind: input, shape index: {}]   ;;  %s1222_s2 = inlined_call_operand.vmem [shape: f32[1,128], index: 2, kind: input, shape index: {}]   ;;  %s1223_s3 = inlined_call_operand.vmem [shape: f32[1,128], index: 3, kind: input, shape index: {}]   ;;  %s1224_s4 = inlined_call_operand.vmem [shape: f32[1,128], index: 4, kind: input, shape index: {}]   ;;  %s1225_s5 = inlined_call_operand.hbm [shape: f32[128,128], index: 5, kind: output, shape index: {}]  }
   0x1   :  { %12 = vsyncpa [#allocation3 + $0x1], 0  ;;  %s985_s18 = smov 0   ;;  %s987_s19 = smov 0  }
   0x2   :  { %s989_s20 = smov 0   ;;  %s991_s21 = smov 0  }
   0x3 LB: > { %s1006_s22 = sadd.s32 4294967295, %s950_s21   ;;  %s713_s23 = sadd.s32 4294967294, %s950_s21   ;;  %s950_s21 = sphi %s991_s21, %s1231_s21   ;;  %s946_s20 = sphi %s989_s20, %s1230_s20   ;;  %s942_s19 = sphi %s987_s19, %s1229_s19   ;;  %s938_s18 = sphi %s985_s18, %s1228_s18  }
   0x4   : > { %s1010_s24 = sadd.s32 1, %s950_s21   ;;  %s135_s25 = sadd.s32 1, %s946_s20 }
   0x5   : > { %s132_s26 = ssub.s32 %s950_s21, %s1010_s24  ;;  %p145_p0 = scmp.ne.s32.totalorder %s946_s20, %s942_s19 }
   0x6   : > { %p133_p1 = scmp.eq.s32.totalorder %s132_s26, 0  ;;  %p146_p2 = scmp.eq.s32.totalorder %s1006_s22, 1 }
   0x7   : > { %p151_p3 = scmp.ne.s32.totalorder %s942_s19, %s938_s18  ;;  %p152_p4 = scmp.eq.s32.totalorder %s713_s23, 1 }
   0x8   : > { %s1021_s27 = scalar_select %p133_p1, %s946_s20, %s135_s25  }
   0x9   : > { %p1023_p5 = por %p146_p2, %p145_p0  ;;  %p1027_p6 = por %p152_p4, %p151_p3 }
   0xa   : > { %p716_p7 = scmp.ge.s32.totalorder %s950_s21, 1  ;;  %p192_p8 = scmp.lt.s32.totalorder %s950_s21, 3 }
   0xc   : > { %p193_p9 = pnand %p716_p7, %p192_p8 }
   0xd   : > { %s718_s9 = sshll.u32 (!%p193_p9), %s1006_s22, 3  ;;  %s218_s16 = sand.u32 (!%p193_p9), 1, %s942_s19  }
   0xe   : > { %196 = sbr.rel (%p193_p9) target bundleno = 485 (0x1e5), region = 40  ;;  %p222_p10 = scmp.lt.s32.totalorder (!%p193_p9), %s718_s9, 15 }
   0xf   : > { %s717_s30 = sshll.u32 (!%p193_p9), %s218_s16, 6  ;;  %s816_s7 = sshll.u32 (!%p193_p9), %s1006_s22, 6 }
  0x10   : > { %s1146_s6 = scalar_lea.vmem (!%p193_p9), [#allocation2], %s717_s30  ;;  %s647_s22 = scalar_lea.hbm (!%p193_p9), %s1225_s5, %s816_s7 }
  0x11   : > { %s648_s10 = sshll.u32 (!%p193_p9), %s1146_s6, 4  ;;  %s650_s11 = sshll.u32 (!%p193_p9), %s647_s22, 4  ;;  %s649_s10 = int_to_ptr.vmem [resolvable:$true] %s648_s10  ;;  %s651_s11 = int_to_ptr.hbm [resolvable:$true] %s650_s11 }
  0x12   : > { %s636_s12 = scalar_lea.sflag (!%p193_p9), [#allocation3], %s218_s16  ;;  %s902_s13 = sshra.s32 (!%p193_p9), %s651_s11, 4  ;;  %s903_s13 = int_to_ptr.hbm [resolvable:$true] %s902_s13 }
  0x13   : > { %v814_v0 = vld [vmem:[%s1221_s1 + $0x38] sm:$0xff]  ;;  %v256_v1 = vld [vmem:[%s1221_s1 + $0x48] sm:$0x3]  ;;  %vm367_vm0 = vcmask 1040384   ;;  %vm368_vm1 = vcmask 1041408   ;;  %v813_v3 = vld [vmem:[%s1221_s1 + $0x30] sm:$0xff]  ;;  %p909_p0 = scmp.lt.s32.totalorder %s903_s13, %s1225_s5 }
  0x14   : > { %v334_v2 = vunpack.c.l.b16 %v256_v1  ;;  %374 = vmatpush.bf16.msra.mxu0 %v814_v0  ;;  %817 = vmatpush.bf16.msra.mxu2 %v814_v0  ;;  %v952_v4 = vmov 65535   ;;  %s1233_s9 = smov (!%p222_p10, %s718_s9), 15  ;;  %v812_v9 = vld [vmem:[%s1221_s1 + $0x28] sm:$0xff]  ;;  %v815_v10 = vld [vmem:[%s1221_s1 + $0x40] sm:$0xff]  ;;  %vm354_vm2 = vcmask 154624   ;;  %v810_v18 = vld [vmem:[%s1221_s1 + $0x18] sm:$0xff] }
  0x15   : > { %v369_v5 = vsel %vm367_vm0, 4294967295, %v952_v4  ;;  %s798_s14 = sshll.u32 %s1233_s9, 3  ;;  %v811_v14 = vld [vmem:[%s1221_s1 + $0x20] sm:$0xff]  ;;  %v809_v19 = vld [vmem:[%s1221_s1 + $0x10] sm:$0xff]  ;;  %v808_v20 = vld [vmem:[%s1221_s1 + $0x8] sm:$0xff]  ;;  %s908_s23 = scalar_lea.hbm %s1225_s5, 128 }
  0x16   : > { %v344_v6 = vpack.c.b16 %v334_v2, %v334_v2  ;;  %v370_v7 = vsel %vm368_vm1, %v369_v5, 0  ;;  %s1052_s25 = scalar_lea.vmem %s1220_s0, %s798_s14  ;;  %v807_v24 = vld [vmem:[%s1221_s1] sm:$0xff]  ;;  %s904_s14 = scalar_lea.hbm %s903_s13, 64 }
  0x17   : > { %v801_v11 = vld [vmem:[%s1052_s25 + $0x14] sm:$0xf]  ;;  %v733_v12 = vld [vmem:[%s1052_s25 + $0x18] sm:$0xf0]  ;;  %v799_v15 = vld [vmem:[%s1052_s25 + $0x4] sm:$0xf]  ;;  %p905_p11 = scmp.ne.s32.totalorder %s903_s13, %s904_s14  ;;  %p910_p1 = scmp.lt.s32.totalorder %s908_s23, %s904_s14 }
  0x18   : > { %v372_v8 = vand.u32 %v370_v7, %v344_v6  ;;  %375 = vmatpush.bf16.msra.mxu0 %v813_v3  ;;  %818 = vmatpush.bf16.msra.mxu2 %v813_v3  ;;  %v736_v13 = vor.u32 %v801_v11, %v733_v12  ;;  %v725_v16 = vld [vmem:[%s1052_s25 + $0x8] sm:$0xf0]  ;;  %v803_v21 = vld [vmem:[%s1052_s25 + $0x24] sm:$0xf]  ;;  %v723_v25 = vld [vmem:[%s1052_s25] sm:$0xf] }
  0x19   : > { %v728_v17 = vor.u32 %v799_v15, %v725_v16  ;;  %v741_v22 = vld [vmem:[%s1052_s25 + $0x28] sm:$0xf0]  ;;  %v800_v26 = vld [vmem:[%s1052_s25 + $0x4] sm:$0xf0]  ;;  %v739_v27 = vld [vmem:[%s1052_s25 + $0x20] sm:$0xf]  ;;  %p906_p12 = pnand %p905_p11, %p1023_p5  ;;  %p911_p2 = por %p910_p1, %p909_p0 }
  0x1a   : > { %825 = vmatpush.bf16.msra.mxu3 %v372_v8  ;;  %409 = vmatpush.bf16.msra.mxu1 %v372_v8  ;;  %v744_v23 = vor.u32 %v803_v21, %v741_v22  ;;  %v804_v28 = vld [vmem:[%s1052_s25 + $0x24] sm:$0xf0]  ;;  %v724_v29 = vor.u32 %v800_v26, %v723_v25  ;;  %v805_v31 = vld [vmem:[%s1052_s25 + $0x34] sm:$0xf]  ;;  %v749_v32 = vld [vmem:[%s1052_s25 + $0x38] sm:$0xf0] }
  0x1b   : > { %v740_v30 = vor.u32 %v804_v28, %v739_v27  ;;  %v752_v33 = vor.u32 %v805_v31, %v749_v32  ;;  %v731_v34 = vld [vmem:[%s1052_s25 + $0x10] sm:$0xf]  ;;  %v802_v35 = vld [vmem:[%s1052_s25 + $0x14] sm:$0xf0]  ;;  %v869_v42 = vld [vmem:[%s1222_s2] ss:$0 sm:$0xff]  ;;  %p907_p13 = pneg %p906_p12 }
  0x1c   : > { %376 = vmatpush.bf16.msra.mxu0 %v812_v9  ;;  %819 = vmatpush.bf16.msra.mxu2 %v812_v9  ;;  %v747_v36 = vld [vmem:[%s1052_s25 + $0x30] sm:$0xf]  ;;  %v806_v37 = vld [vmem:[%s1052_s25 + $0x34] sm:$0xf0]  ;;  %v732_v38 = vor.u32 %v802_v35, %v731_v34  ;;  %v464_v9 = vlaneseq }
  0x1d   : > { %v748_v39 = vor.u32 %v806_v37, %v747_v36  ;;  %p912_p3 = pnand %p911_p2, %p907_p13 }
  0x1e   : > { %826 = vmatpush.bf16.msra.mxu3 %v815_v10  ;;  %410 = vmatpush.bf16.msra.mxu1 %v815_v10  ;;  %v465_v10 = vand.u32 127, %v464_v9 }
  0x20   : > { %377 = vmatpush.bf16.msra.mxu0 %v811_v14  ;;  %820 = vmatpush.bf16.msra.mxu2 %v811_v14  ;;  %vm466_vm3 = vcmp.lt.s32.totalorder %v465_v10, 96  ;;  %v1136_v10 = vld [vmem:[%s1224_s4] ss:$0 sm:$0xff] }
  0x21   : > { %790 = vmatmul.msk.bf16.vlgmr.msra.gmra.mxu3 %vm354_vm2, %v736_v13  ;;  %789 = vmatmul.msk.bf16.vlgmr.msra.gmra.mxu1 %vm354_vm2, %v728_v17 }
  0x24   : > { %378 = vmatpush.bf16.msra.mxu0 %v810_v18  ;;  %821 = vmatpush.bf16.msra.mxu2 %v810_v18 }
  0x28   : > { %379 = vmatpush.bf16.msra.mxu0 %v809_v19  ;;  %822 = vmatpush.bf16.msra.mxu2 %v809_v19 }
  0x2c   : > { %380 = vmatpush.bf16.msra.mxu0 %v808_v20  ;;  %823 = vmatpush.bf16.msra.mxu2 %v808_v20 }
  0x30   : > { %381 = vmatpush.bf16.msra.mxu0 %v807_v24  ;;  %824 = vmatpush.bf16.msra.mxu2 %v807_v24 }
  0x31   : > { %791 = vmatmul.msk.bf16.gmra.mxu3 %vm354_vm2, %v744_v23 }
  0x33   : > { %382 = vmatmul.bf16.vlgmr.msra.gmra.mxu0 %v724_v29  ;;  %392 = vmatmul.bf16.vlgmr.msra.gmra.mxu2 %v740_v30 }
  0x41   : > { %792 = vmatmul.msk.bf16.gmra.mxu3 %vm354_vm2, %v752_v33 }
  0x43   : > { %387 = vmatmul.bf16.gmra.mxu0 %v732_v38  ;;  %397 = vmatmul.bf16.gmra.mxu2 %v748_v39 }
  0x9e   : > { %v412_v43 = vpop.f32.mrf.mxu1 }
  0xa4   : > { %v417_v40 = vpop.f32.mrf.mxu3 }
  0xa6   : > { %v414_v51 = vpop.f32.mrf.mxu1 }
  0xac   : > { %v419_v41 = vpop.f32.mrf.mxu3 }
  0xb0   : > { %v383_v44 = vpop.f32.mrf.mxu0 }
  0xb1   : > { %v384_v45 = vadd.f32 %v869_v42, %v383_v44 }
  0xb3   : > { %v413_v46 = vadd.f32 %v412_v43, %v384_v45 }
  0xb4   : > { %v422_v47 = vpop.f32.mrf.mxu3 }
  0xb5   : > { %432 = vadd.xlane.f32.xlu0 %v413_v46 }
  0xb6   : > { %v393_v48 = vpop.f32.mrf.mxu2 }
  0xb7   : > { %v394_v49 = vadd.f32 %v869_v42, %v393_v48 }
  0xb8   : > { %v385_v50 = vpop.f32.mrf.mxu0 }
  0xb9   : > { %v386_v52 = vadd.f32 %v869_v42, %v385_v50  ;;  %v423_v53 = vadd.f32 %v422_v47, %v394_v49 }
  0xbb   : > { %v415_v54 = vadd.f32 %v414_v51, %v386_v52  ;;  %440 = vadd.xlane.f32.xlu2 %v423_v53 }
  0xbc   : > { %v424_v55 = vpop.f32.mrf.mxu3 }
  0xbd   : > { %434 = vadd.xlane.f32.xlu0 %v415_v54 }
  0xbe   : > { %v395_v56 = vpop.f32.mrf.mxu2 }
  0xbf   : > { %v396_v57 = vadd.f32 %v869_v42, %v395_v56 }
  0xc0   : > { %v388_v58 = vpop.f32.mrf.mxu0 }
  0xc1   : > { %v389_v59 = vadd.f32 %v869_v42, %v388_v58  ;;  %v425_v60 = vadd.f32 %v424_v55, %v396_v57 }
  0xc3   : > { %v418_v61 = vadd.f32 %v417_v40, %v389_v59  ;;  %442 = vadd.xlane.f32.xlu2 %v425_v60 }
  0xc4   : > { %v427_v63 = vpop.f32.mrf.mxu3 }
  0xc5   : > { %436 = vadd.xlane.f32.xlu1 %v418_v61 }
  0xc6   : > { %v398_v62 = vpop.f32.mrf.mxu2 }
  0xc7   : > { %v399_v0 = vadd.f32 %v869_v42, %v398_v62 }
  0xc8   : > { %v390_v1 = vpop.f32.mrf.mxu0 }
  0xc9   : > { %v391_v2 = vadd.f32 %v869_v42, %v390_v1  ;;  %v428_v3 = vadd.f32 %v427_v63, %v399_v0 }
  0xcb   : > { %v420_v4 = vadd.f32 %v419_v41, %v391_v2  ;;  %444 = vadd.xlane.f32.xlu0 %v428_v3 }
  0xcc   : > { %v429_v7 = vpop.f32.mrf.mxu3 }
  0xcd   : > { %438 = vadd.xlane.f32.xlu1 %v420_v4 }
  0xce   : > { %v400_v5 = vpop.f32.mrf.mxu2 }
  0xcf   : > { %v401_v6 = vadd.f32 %v869_v42, %v400_v5 }
  0xd1   : > { %v430_v8 = vadd.f32 %v429_v7, %v401_v6  ;;  %v1130_v7 = vld [vmem:[%s1223_s3] ss:$0 sm:$0xff] }
  0xd5   : > { %446 = vadd.xlane.f32.xlu1 %v430_v8 }
 0x128   : > { %v433_v11 = vpop.xlane.xlu0 %432 }
 0x129   : > { %v448_v12 = vmul.f32 0.010416667, %v433_v11 }
 0x12b   : > { %v1092_v13 = vsub.f32 %v413_v46, %v448_v12 }
 0x12d   : > { %v467_v14 = vsel %vm466_vm3, %v1092_v13, 0.0 }
 0x12e   : > { %v475_v15 = vmul.f32 %v467_v14, %v467_v14  ;;  %v441_v16 = vpop.xlane.xlu2 %440 }
 0x12f   : > { %v452_v17 = vmul.f32 0.010416667, %v441_v16 }
 0x130   : > { %483 = vadd.xlane.f32.xlu2 %v475_v15  ;;  %v435_v18 = vpop.xlane.xlu0 %434 }
 0x131   : > { %v1096_v19 = vsub.f32 %v423_v53, %v452_v17  ;;  %v449_v20 = vmul.f32 0.010416667, %v435_v18 }
 0x133   : > { %v471_v21 = vsel %vm466_vm3, %v1096_v19, 0.0  ;;  %v1100_v23 = vsub.f32 %v415_v54, %v449_v20 }
 0x134   : > { %v479_v22 = vmul.f32 %v471_v21, %v471_v21 }
 0x135   : > { %v468_v27 = vsel %vm466_vm3, %v1100_v23, 0.0 }
 0x136   : > { %491 = vadd.xlane.f32.xlu0 %v479_v22  ;;  %v443_v24 = vpop.xlane.xlu2 %442  ;;  %v476_v30 = vmul.f32 %v468_v27, %v468_v27 }
 0x137   : > { %v453_v28 = vmul.f32 0.010416667, %v443_v24 }
 0x138   : > { %v437_v25 = vpop.xlane.xlu1 %436 }
 0x139   : > { %v450_v26 = vmul.f32 0.010416667, %v437_v25  ;;  %v1108_v33 = vsub.f32 %v425_v60, %v453_v28 }
 0x13b   : > { %v1104_v29 = vsub.f32 %v418_v61, %v450_v26  ;;  %v472_v39 = vsel %vm466_vm3, %v1108_v33, 0.0 }
 0x13c   : > { %v480_v41 = vmul.f32 %v472_v39, %v472_v39 }
 0x13d   : > { %v469_v31 = vsel %vm466_vm3, %v1104_v29, 0.0 }
 0x13e   : > { %v477_v32 = vmul.f32 %v469_v31, %v469_v31  ;;  %485 = vadd.xlane.f32.xlu0 %v476_v30  ;;  %v445_v34 = vpop.xlane.xlu0 %444 }
 0x13f   : > { %v454_v37 = vmul.f32 0.010416667, %v445_v34 }
 0x140   : > { %487 = vadd.xlane.f32.xlu1 %v477_v32  ;;  %v439_v35 = vpop.xlane.xlu1 %438 }
 0x141   : > { %v451_v36 = vmul.f32 0.010416667, %v439_v35  ;;  %v1116_v43 = vsub.f32 %v428_v3, %v454_v37 }
 0x143   : > { %v1110_v38 = vsub.f32 %v420_v4, %v451_v36  ;;  %v473_v47 = vsel %vm466_vm3, %v1116_v43, 0.0 }
 0x144   : > { %v481_v50 = vmul.f32 %v473_v47, %v473_v47 }
 0x145   : > { %v470_v40 = vsel %vm466_vm3, %v1110_v38, 0.0 }
 0x146   : > { %v478_v42 = vmul.f32 %v470_v40, %v470_v40 }
 0x148   : > { %493 = vadd.xlane.f32.xlu1 %v480_v41  ;;  %v447_v44 = vpop.xlane.xlu1 %446  ;;  %489 = vadd.xlane.f32.xlu2 %v478_v42 }
 0x149   : > { %v455_v45 = vmul.f32 0.010416667, %v447_v44 }
 0x14b   : > { %v1118_v46 = vsub.f32 %v430_v8, %v455_v45 }
 0x14d   : > { %v474_v48 = vsel %vm466_vm3, %v1118_v46, 0.0 }
 0x14e   : > { %v482_v49 = vmul.f32 %v474_v48, %v474_v48 }
 0x150   : > { %497 = vadd.xlane.f32.xlu0 %v482_v49  ;;  %495 = vadd.xlane.f32.xlu2 %v481_v50 }
 0x1a3   : > { %v484_v51 = vpop.xlane.xlu2 %483 }
 0x1a4   : > { %v499_v52 = vmul.f32 0.010416667, %v484_v51 }
 0x1a6   : > { %v507_v53 = vadd.f32 1e-05, %v499_v52 }
 0x1a8   : > { %872 = vrsqrt.f32 %v507_v53  ;;  %vm521_vm5 = vweird.f32 %v507_v53 }
 0x1a9   : > { %v492_v54 = vpop.xlane.xlu0 %491 }
 0x1aa   : > { %v503_v55 = vmul.f32 0.010416667, %v492_v54 }
 0x1ac   : > { %v511_v56 = vadd.f32 1e-05, %v503_v55 }
 0x1ae   : > { %v873_v57 = vpop.eup %872  ;;  %874 = vrsqrt.f32 %v511_v56  ;;  %vm561_vm8 = vweird.f32 %v511_v56 }
 0x1af   : > { %v516_v58 = vmul.f32 %v873_v57, %v507_v53  ;;  %vm522_vm4 = vweird.f32 %v873_v57 }
 0x1b0   : > { %vm523_vm6 = vmor %vm521_vm5, %vm522_vm4 }
 0x1b1   : > { %v517_v59 = vmul.f32 %v873_v57, %v516_v58  ;;  %v486_v60 = vpop.xlane.xlu0 %485 }
 0x1b2   : > { %v500_v62 = vmul.f32 0.010416667, %v486_v60 }
 0x1b3   : > { %v518_v61 = vmul.f32 0.5, %v517_v59  ;;  %v488_v63 = vpop.xlane.xlu1 %487 }
 0x1b4   : > { %v501_v0 = vmul.f32 0.010416667, %v488_v63  ;;  %v875_v1 = vpop.eup %874  ;;  %v508_v3 = vadd.f32 1e-05, %v500_v62 }
 0x1b5   : > { %v519_v2 = vsub.f32 1.5, %v518_v61  ;;  %v556_v4 = vmul.f32 %v875_v1, %v511_v56  ;;  %vm562_vm7 = vweird.f32 %v875_v1 }
 0x1b6   : > { %v1124_v5 = vadd.f32 1e-05, %v501_v0  ;;  %876 = vrsqrt.f32 %v508_v3  ;;  %vm563_vm9 = vmor %vm561_vm8, %vm562_vm7  ;;  %vm531_vm12 = vweird.f32 %v508_v3 }
 0x1b7   : > { %v520_v6 = vmul.f32 %v873_v57, %v519_v2  ;;  %v557_v8 = vmul.f32 %v875_v1, %v556_v4 }
 0x1b8   : > { %878 = vrsqrt.f32 %v1124_v5  ;;  %vm541_vm14 = vweird.f32 %v1124_v5 }
 0x1b9   : > { %v524_v9 = vsel %vm523_vm6, %v873_v57, %v520_v6  ;;  %v558_v12 = vmul.f32 0.5, %v557_v8 }
 0x1ba   : > { %v595_v11 = vmul.f32 %v524_v9, %v1092_v13 }
 0x1bb   : > { %v494_v14 = vpop.xlane.xlu1 %493  ;;  %v490_v15 = vpop.xlane.xlu2 %489  ;;  %v559_v17 = vsub.f32 1.5, %v558_v12 }
 0x1bc   : > { %v607_v16 = vmul.f32 %v1130_v7, %v595_v11  ;;  %v504_v18 = vmul.f32 0.010416667, %v494_v14  ;;  %v502_v20 = vmul.f32 0.010416667, %v490_v15  ;;  %v877_v21 = vpop.eup %876 }
 0x1bd   : > { %v560_v25 = vmul.f32 %v875_v1, %v559_v17  ;;  %v526_v26 = vmul.f32 %v877_v21, %v508_v3  ;;  %vm532_vm10 = vweird.f32 %v877_v21 }
 0x1be   : > { %v879_v22 = vpop.eup %878  ;;  %v619_v24 = vadd.f32 %v1136_v10, %v607_v16  ;;  %v512_v13 = vadd.f32 1e-05, %v504_v18  ;;  %v1144_v28 = vadd.f32 1e-05, %v502_v20  ;;  %vm533_vm13 = vmor %vm531_vm12, %vm532_vm10 }
 0x1bf   : > { %v536_v27 = vmul.f32 %v879_v22, %v1124_v5  ;;  %v564_v30 = vsel %vm563_vm9, %v875_v1, %v560_v25  ;;  %v527_v31 = vmul.f32 %v877_v21, %v526_v26  ;;  %vm542_vm11 = vweird.f32 %v879_v22 }
 0x1c0   : > { %627 = vst [vmem:[%s1146_s6] sm:$0xff] %v619_v24  ;;  %v599_v32 = vmul.f32 %v564_v30, %v1096_v19  ;;  %880 = vrsqrt.f32 %v512_v13  ;;  %vm543_vm15 = vmor %vm541_vm14, %vm542_vm11  ;;  %vm571_vm2 = vweird.f32 %v512_v13  ;;  %vm551_vm4 = vweird.f32 %v1144_v28 }
 0x1c1   : > { %v537_v34 = vmul.f32 %v879_v22, %v536_v27  ;;  %v528_v35 = vmul.f32 0.5, %v527_v31  ;;  %882 = vrsqrt.f32 %v1144_v28 }
 0x1c2   : > { %v611_v36 = vmul.f32 %v1130_v7, %v599_v32 }
 0x1c3   : > { %v538_v37 = vmul.f32 0.5, %v537_v34  ;;  %v496_v39 = vpop.xlane.xlu2 %495  ;;  %v498_v40 = vpop.xlane.xlu0 %497  ;;  %v529_v41 = vsub.f32 1.5, %v528_v35 }
 0x1c4   : > { %v505_v42 = vmul.f32 0.010416667, %v496_v39  ;;  %v506_v44 = vmul.f32 0.010416667, %v498_v40  ;;  %v623_v45 = vadd.f32 %v1136_v10, %v611_v36 }
 0x1c5   : > { %v539_v47 = vsub.f32 1.5, %v538_v37  ;;  %v530_v19 = vmul.f32 %v877_v21, %v529_v41 }
 0x1c6   : > { %v513_v48 = vadd.f32 1e-05, %v505_v42  ;;  %v1153_v49 = vadd.f32 1e-05, %v506_v44  ;;  %v881_v50 = vpop.eup %880  ;;  %631 = vst [vmem:[%s1146_s6 + $0x20] sm:$0xff] %v623_v45 }
 0x1c7   : > { %v540_v51 = vmul.f32 %v879_v22, %v539_v47  ;;  %v883_v52 = vpop.eup %882  ;;  %v534_v53 = vsel %vm533_vm13, %v877_v21, %v530_v19  ;;  %v566_v54 = vmul.f32 %v881_v50, %v512_v13  ;;  %vm572_vm0 = vweird.f32 %v881_v50 }
 0x1c8   : > { %884 = vrsqrt.f32 %v513_v48  ;;  %v596_v55 = vmul.f32 %v534_v53, %v1100_v23  ;;  %v546_v57 = vmul.f32 %v883_v52, %v1144_v28  ;;  %vm552_vm1 = vweird.f32 %v883_v52  ;;  %vm573_vm3 = vmor %vm571_vm2, %vm572_vm0 }
 0x1c9   : > { %v544_v56 = vsel %vm543_vm15, %v879_v22, %v540_v51  ;;  %v567_v59 = vmul.f32 %v881_v50, %v566_v54  ;;  %886 = vrsqrt.f32 %v1153_v49  ;;  %vm553_vm5 = vmor %vm551_vm4, %vm552_vm1  ;;  %vm581_vm7 = vweird.f32 %v513_v48 }
 0x1ca   : > { %v597_v58 = vmul.f32 %v544_v56, %v1104_v29  ;;  %v608_v60 = vmul.f32 %v1130_v7, %v596_v55  ;;  %v547_v61 = vmul.f32 %v883_v52, %v546_v57  ;;  %vm591_vm10 = vweird.f32 %v1153_v49 }
 0x1cb   : > { %v568_v63 = vmul.f32 0.5, %v567_v59 }
 0x1cc   : > { %v609_v62 = vmul.f32 %v1130_v7, %v597_v58  ;;  %v620_v0 = vadd.f32 %v1136_v10, %v608_v60  ;;  %v548_v1 = vmul.f32 0.5, %v547_v61 }
 0x1cd   : > { %v569_v3 = vsub.f32 1.5, %v568_v63 }
 0x1ce   : > { %v885_v23 = vpop.eup %884  ;;  %v621_v2 = vadd.f32 %v1136_v10, %v609_v62  ;;  %628 = vst [vmem:[%s1146_s6 + $0x8] sm:$0xff] %v620_v0  ;;  %v549_v29 = vsub.f32 1.5, %v548_v1 }
 0x1cf   : > { %v576_v4 = vmul.f32 %v885_v23, %v513_v48  ;;  %v887_v5 = vpop.eup %886  ;;  %v570_v6 = vmul.f32 %v881_v50, %v569_v3  ;;  %vm582_vm6 = vweird.f32 %v885_v23 }
 0x1d0   : > { %629 = vst [vmem:[%s1146_s6 + $0x10] sm:$0xff] %v621_v2  ;;  %v550_v8 = vmul.f32 %v883_v52, %v549_v29  ;;  %v586_v11 = vmul.f32 %v887_v5, %v1153_v49  ;;  %vm592_vm8 = vweird.f32 %v887_v5  ;;  %vm583_vm9 = vmor %vm581_vm7, %vm582_vm6 }
 0x1d1   : > { %v577_v9 = vmul.f32 %v885_v23, %v576_v4  ;;  %v574_v12 = vsel %vm573_vm3, %v881_v50, %v570_v6  ;;  %vm593_vm11 = vmor %vm591_vm10, %vm592_vm8 }
 0x1d2   : > { %v600_v14 = vmul.f32 %v574_v12, %v1108_v33  ;;  %v554_v15 = vsel %vm553_vm5, %v883_v52, %v550_v8  ;;  %v587_v17 = vmul.f32 %v887_v5, %v586_v11 }
 0x1d3   : > { %v578_v16 = vmul.f32 0.5, %v577_v9  ;;  %v598_v18 = vmul.f32 %v554_v15, %v1110_v38 }
 0x1d4   : > { %v612_v20 = vmul.f32 %v1130_v7, %v600_v14  ;;  %v588_v22 = vmul.f32 0.5, %v587_v17 }
 0x1d5   : > { %v579_v21 = vsub.f32 1.5, %v578_v16  ;;  %v610_v24 = vmul.f32 %v1130_v7, %v598_v18 }
 0x1d6   : > { %v624_v25 = vadd.f32 %v1136_v10, %v612_v20  ;;  %v589_v33 = vsub.f32 1.5, %v588_v22 }
 0x1d7   : > { %v580_v26 = vmul.f32 %v885_v23, %v579_v21  ;;  %v622_v27 = vadd.f32 %v1136_v10, %v610_v24 }
 0x1d8   : > { %632 = vst [vmem:[%s1146_s6 + $0x28] sm:$0xff] %v624_v25  ;;  %v590_v13 = vmul.f32 %v887_v5, %v589_v33 }
 0x1d9   : > { %v584_v38 = vsel %vm583_vm9, %v885_v23, %v580_v26  ;;  %630 = vst [vmem:[%s1146_s6 + $0x18] sm:$0xff] %v622_v27 }
 0x1da   : > { %v601_v28 = vmul.f32 %v584_v38, %v1116_v43  ;;  %v594_v30 = vsel %vm593_vm11, %v887_v5, %v590_v13 }
 0x1db   : > { %v602_v32 = vmul.f32 %v594_v30, %v1118_v46 }
 0x1dc   : > { %v613_v31 = vmul.f32 %v1130_v7, %v601_v28 }
 0x1dd   : > { %v614_v35 = vmul.f32 %v1130_v7, %v602_v32 }
 0x1de   : > { %v625_v34 = vadd.f32 %v1136_v10, %v613_v31 }
 0x1df   : > { %v626_v36 = vadd.f32 %v1136_v10, %v614_v35 }
 0x1e0   : > { %633 = vst [vmem:[%s1146_s6 + $0x30] sm:$0xff] %v625_v34 }
 0x1e1   : > { %634 = vst [vmem:[%s1146_s6 + $0x38] sm:$0xff] %v626_v36 }
 0x1e2   : > { %915 = shalt.err (!%p912_p3)
}
 0x1e3   : > { %s953_s16 = smov 128   ;;  %s954_s30 = smov 8  }
 0x1e4   : > { %827 = dma.vmem_to_hbm [thread:$0]  (%p1023_p5), %s649_s10, 1024, %s651_s11, %s636_s12, %s953_s16, %s953_s16, %s954_s30  }
 0x1e5 PF: > { %p833_p4 = scmp.ge.s32.totalorder %s950_s21, 2  ;;  %s665_s6 = sand.u32 1, %s938_s18  }
 0x1e6   : > { %s666_s7 = scalar_lea.sflag [#allocation3], %s665_s6 }
 0x1e7   : > { %p830_p7 = pnand %p833_p4, %p1027_p6 }
 0x1e9   : > { %p831_p8 = pneg %p830_p7 }
 0x1eb   : > { %933 = dma.done.wait (%p831_p8), %s666_s7, 1024  }
 0x1ec   : > { %935 = vsyncadd (%p831_p8), %s666_s7, 4294966272  ;;  %p15_p9 = scmp.ge.s32.totalorder %s1010_s24, 4   ;;  %s1228_s18 = smov %s942_s19 }
 0x1ed   : > { %s1229_s19 = smov %s946_s20  ;;  %s1230_s20 = smov %s1021_s27 }
 0x1ee   : > { %s1231_s21 = smov %s1010_s24  ;;  %17 = sbr.rel (!%p15_p9) target bundleno = 3 (0x3), region = 75 }
 0x1f3   :  { %672 = vsyncpa [#allocation3], 1 }
 0x1f4   :  { %674 = vsyncpa [#allocation3 + $0x1], 1 }

</bundles_post_ra>
